<compile_context>
chip_gen: v5e
topology: v5e:2x2
jax: 0.10.0
libtpu: 0.0.40
codegen_flags: <defaults>
</compile_context>

<pallas_src>
import jax
import jax.numpy as jnp
from jax.experimental import pallas as pl
from jax.experimental.pallas import tpu as pltpu

EPS = 1e-5
HIDDEN = 50

_X_TILE_BUDGET = 16 * 1024 * 1024    # bytes for double-buffered x tiles (safe on v7x)
_FUSED_X_BUDGET = 16 * 1024 * 1024   # bytes for the resident (double-buffered) x copy


def _round_up(x, m):
    return ((x + m - 1) // m) * m


def _choose_tile(B, F, tile_b):
    # Lane-dense output wants tb % 128 == 0; cap so 2 double-buffered x tiles stay small.
    tb = max(128, _round_up(max(1, min(tile_b, B)), 128))
    max_tb = max(128, (_X_TILE_BUDGET // (2 * F * 4)) // 128 * 128)
    return min(tb, max_tb)


def _vmem_limit(bytes_needed):
    # Raise above the v5e/v6e default scoped limits, stay well under v7x's 64 MiB.
    return int(min(48 * 1024 * 1024, max(32 * 1024 * 1024, 2 * bytes_needed)))


def nn_baseline_forward(x, gamma, beta, w1, b1, w2, b2, *,
                        tile_b=1024, use_bf16=True, force_two_pass=False):
    """Forward pass of NN_baseline (PyTorch training-mode BatchNorm1d statistics)."""
    B, F = x.shape
    H = w1.shape[1]

    tb = _choose_tile(B, F, tile_b)
    b_pad = _round_up(B, tb)
    num_tiles = b_pad // tb
    n_pad = b_pad - B
    x_p = x if n_pad == 0 else jnp.pad(x, ((0, n_pad), (0, 0)))

    x_bytes = b_pad * F * x_p.dtype.itemsize
    param_bytes = 4 * (2 * F + F * H + 3 * H + 1)
    out_bytes = b_pad * 4
    stats_flops = 4 * b_pad * F
    mlp_flops = 2 * b_pad * F * H + 4 * b_pad * H

    use_fused = (not force_two_pass) and (2 * x_bytes <= _FUSED_X_BUDGET)

    def second_layer(h, w2v, b2v):
        # Linear(H, 1), laid out lane-dense: (1, H) @ (H, tb) -> (1, tb) so the output
        # store is a full-width (unmasked) lane vector, not a (tb, 1) masked store.
        return jnp.dot(w2v, h.T, preferred_element_type=jnp.float32) + b2v

    if use_fused:
        # ---------------- fused kernel: x is read from HBM exactly once ----------------
        def fused_kernel(x_ref, gamma_ref, beta_ref, w1_ref, b1_ref, w2_ref, b2_ref,
                         o_ref, scale_ref, shift_ref):
            i = pl.program_id(0)

            @pl.when(i == 0)
            def _():
                inv_b = 1.0 / B
                zero = jnp.zeros((1, F), jnp.float32)

                def sum_body(t, acc):
                    s = pl.multiple_of(t * tb, tb)
                    xt = x_ref[pl.ds(s, tb), :].astype(jnp.float32)
                    return acc + jnp.sum(xt, axis=0, keepdims=True)

                mean = jax.lax.fori_loop(0, num_tiles, sum_body, zero) * inv_b

                def var_body(t, acc):
                    s = pl.multiple_of(t * tb, tb)
                    d = x_ref[pl.ds(s, tb), :].astype(jnp.float32) - mean
                    return acc + jnp.sum(d * d, axis=0, keepdims=True)

                ssq = jax.lax.fori_loop(0, num_tiles, var_body, zero)
                if n_pad:  # zero-padded rows each contributed (0 - mean)^2; remove exactly
                    ssq = ssq - float(n_pad) * mean * mean
                var = jnp.maximum(ssq * inv_b, 0.0)           # biased variance (PyTorch BN)
                scale = gamma_ref[...] * jax.lax.rsqrt(var + EPS)
                scale_ref[...] = scale
                shift_ref[...] = beta_ref[...] - mean * scale

            start = pl.multiple_of(i * tb, tb)
            xn = x_ref[pl.ds(start, tb), :].astype(jnp.float32) * scale_ref[...] + shift_ref[...]
            w1v = w1_ref[...]
            if use_bf16:
                xn = xn.astype(jnp.bfloat16)
                w1v = w1v.astype(jnp.bfloat16)
            h = jnp.dot(xn, w1v, preferred_element_type=jnp.float32) + b1_ref[...]
            h = jnp.maximum(h, 0.0)
            o_ref[...] = second_layer(h, w2_ref[...], b2_ref[0, 0]).astype(o_ref.dtype)

        vmem_need = 2 * x_bytes + 4 * tb * 4 + 2 * param_bytes + 2 * F * 4
        out = pl.pallas_call(
            fused_kernel,
            out_shape=jax.ShapeDtypeStruct((num_tiles, tb), jnp.float32),
            grid_spec=pltpu.PrefetchScalarGridSpec(
                num_scalar_prefetch=0,
                grid=(num_tiles,),
                in_specs=[
                    pl.BlockSpec((b_pad, F), lambda i: (0, 0)),  # x: resident, one HBM read
                    pl.BlockSpec((1, F), lambda i: (0, 0)),      # gamma
                    pl.BlockSpec((1, F), lambda i: (0, 0)),      # beta
                    pl.BlockSpec((F, H), lambda i: (0, 0)),      # w1
                    pl.BlockSpec((1, H), lambda i: (0, 0)),      # b1
                    pl.BlockSpec((1, H), lambda i: (0, 0)),      # w2 row
                    pl.BlockSpec(memory_space=pltpu.MemorySpace.SMEM),  # b2 scalar
                ],
                out_specs=pl.BlockSpec((1, tb), lambda i: (i, 0)),
                scratch_shapes=[pltpu.VMEM((1, F), jnp.float32),
                                pltpu.VMEM((1, F), jnp.float32)],
            ),
            compiler_params=pltpu.CompilerParams(
                dimension_semantics=("arbitrary",),
                vmem_limit_bytes=_vmem_limit(vmem_need)),
            cost_estimate=pl.CostEstimate(
                flops=stats_flops + mlp_flops, transcendentals=0,
                bytes_accessed=x_bytes + out_bytes + param_bytes),
        )(x_p, gamma, beta, w1, b1, w2, b2)

    else:
        # -------- kernel 1: one-pass batch stats reduction -> (scale, shift), [1, F] --------
        def stats_kernel(x_ref, gamma_ref, beta_ref, scale_ref, shift_ref, sum_ref, sq_ref):
            i = pl.program_id(0)
            xt = x_ref[...].astype(jnp.float32)   # zero-padded rows add nothing; no mask

            @pl.when(i == 0)
            def _():
                sum_ref[...] = jnp.zeros_like(sum_ref)
                sq_ref[...] = jnp.zeros_like(sq_ref)

            sum_ref[...] += jnp.sum(xt, axis=0, keepdims=True)
            sq_ref[...] += jnp.sum(xt * xt, axis=0, keepdims=True)

            @pl.when(i == num_tiles - 1)
            def _():
                inv_b = 1.0 / B
                mean = sum_ref[...] * inv_b
                # Note: E[x^2]-mean^2 can cancel for badly non-standardized features; the
                # fused path (x resident) uses exact centered two-pass statistics instead.
                var = jnp.maximum(sq_ref[...] * inv_b - mean * mean, 0.0)
                scale = gamma_ref[...] * jax.lax.rsqrt(var + EPS)
                scale_ref[...] = scale
                shift_ref[...] = beta_ref[...] - mean * scale

        stats_vmem = 2 * tb * F * 4 + 8 * F * 4
        scale, shift = pl.pallas_call(
            stats_kernel,
            out_shape=(jax.ShapeDtypeStruct((1, F), jnp.float32),
                       jax.ShapeDtypeStruct((1, F), jnp.float32)),
            grid_spec=pltpu.PrefetchScalarGridSpec(
                num_scalar_prefetch=0,
                grid=(num_tiles,),
                in_specs=[
                    pl.BlockSpec((tb, F), lambda i: (i, 0)),   # x tiles (pipelined)
                    pl.BlockSpec((1, F), lambda i: (0, 0)),    # gamma (resident)
                    pl.BlockSpec((1, F), lambda i: (0, 0)),    # beta  (resident)
                ],
                out_specs=[
                    pl.BlockSpec((1, F), lambda i: (0, 0)),
                    pl.BlockSpec((1, F), lambda i: (0, 0)),
                ],
                scratch_shapes=[pltpu.VMEM((1, F), jnp.float32),
                                pltpu.VMEM((1, F), jnp.float32)],
            ),
            compiler_params=pltpu.CompilerParams(
                dimension_semantics=("arbitrary",),
                vmem_limit_bytes=_vmem_limit(stats_vmem)),
            cost_estimate=pl.CostEstimate(flops=stats_flops, transcendentals=0,
                                          bytes_accessed=x_bytes + 4 * F * 4),
        )(x_p, gamma, beta)

        # ---- kernel 2: normalize on VPU -> Linear -> ReLU -> Linear, lane-dense output ----
        def mlp_kernel(x_ref, scale_ref, shift_ref, w1_ref, b1_ref, w2_ref, b2_ref, o_ref):
            xn = x_ref[...].astype(jnp.float32) * scale_ref[...] + shift_ref[...]
            w1v = w1_ref[...]
            if use_bf16:
                xn = xn.astype(jnp.bfloat16)
                w1v = w1v.astype(jnp.bfloat16)
            h = jnp.dot(xn, w1v, preferred_element_type=jnp.float32) + b1_ref[...]
            h = jnp.maximum(h, 0.0)
            o_ref[...] = second_layer(h, w2_ref[...], b2_ref[0, 0]).astype(o_ref.dtype)

        mlp_vmem = 2 * tb * F * 4 + 4 * tb * 4 + 2 * param_bytes
        out = pl.pallas_call(
            mlp_kernel,
            out_shape=jax.ShapeDtypeStruct((num_tiles, tb), jnp.float32),
            grid_spec=pltpu.PrefetchScalarGridSpec(
                num_scalar_prefetch=0,
                grid=(num_tiles,),
                in_specs=[
                    pl.BlockSpec((tb, F), lambda i: (i, 0)),   # x tiles (pipelined)
                    pl.BlockSpec((1, F), lambda i: (0, 0)),    # scale (resident)
                    pl.BlockSpec((1, F), lambda i: (0, 0)),    # shift (resident)
                    pl.BlockSpec((F, H), lambda i: (0, 0)),    # w1 (resident)
                    pl.BlockSpec((1, H), lambda i: (0, 0)),    # b1 (resident)
                    pl.BlockSpec((1, H), lambda i: (0, 0)),    # w2 row (resident)
                    pl.BlockSpec(memory_space=pltpu.MemorySpace.SMEM),  # b2 scalar
                ],
                out_specs=pl.BlockSpec((1, tb), lambda i: (i, 0)),
            ),
            compiler_params=pltpu.CompilerParams(
                dimension_semantics=("parallel",),
                vmem_limit_bytes=_vmem_limit(mlp_vmem)),
            cost_estimate=pl.CostEstimate(flops=mlp_flops, transcendentals=0,
                                          bytes_accessed=x_bytes + out_bytes + param_bytes),
        )(x_p, scale, shift, w1, b1, w2, b2)

    return out.reshape(b_pad, 1)[:B]


def reference_forward(x, gamma, beta, w1, b1, w2, b2):
    # PyTorch training-mode BatchNorm1d (batch mean, biased var) -> Linear -> ReLU -> Linear
    mean = jnp.mean(x, axis=0, keepdims=True)
    var = jnp.mean((x - mean) ** 2, axis=0, keepdims=True)
    xn = (x - mean) / jnp.sqrt(var + EPS) * gamma + beta
    h = jnp.maximum(xn @ w1 + b1, 0.0)
    return jnp.sum(h * w2, axis=-1, keepdims=True) + b2


if __name__ == "__main__":
    key = jax.random.PRNGKey(0)
    B, F = 256, 16  # batch, input_size

    kx, kg, kb, kw1, kb1, kw2, kb2 = jax.random.split(key, 7)
    x = jax.random.normal(kx, (B, F), dtype=jnp.float32)

    # Deterministic synthetic parameters (shapes follow the PyTorch module).
    gamma = 1.0 + 0.1 * jax.random.normal(kg, (1, F), dtype=jnp.float32)   # BN weight
    beta = 0.1 * jax.random.normal(kb, (1, F), dtype=jnp.float32)          # BN bias
    w1 = jax.random.normal(kw1, (F, HIDDEN), dtype=jnp.float32) * (1.0 / jnp.sqrt(F))
    b1 = 0.01 * jax.random.normal(kb1, (1, HIDDEN), dtype=jnp.float32)
    w2 = jax.random.normal(kw2, (1, HIDDEN), dtype=jnp.float32) * (1.0 / jnp.sqrt(HIDDEN))
    b2 = 0.01 * jax.random.normal(kb2, (1, 1), dtype=jnp.float32)

    fwd = jax.jit(nn_baseline_forward,
                  static_argnames=("tile_b", "use_bf16", "force_two_pass"))

    ref = reference_forward(x, gamma, beta, w1, b1, w2, b2)

    # 1) fused path (x resident in VMEM, single HBM read), f32 MXU
    out_fused_f32 = jax.block_until_ready(
        fwd(x, gamma, beta, w1, b1, w2, b2, use_bf16=False))
    # 2) fused path, multiple batch tiles, bf16 MXU inputs (f32 accumulate)
    out_fused_bf16 = jax.block_until_ready(
        fwd(x, gamma, beta, w1, b1, w2, b2, tile_b=128, use_bf16=True))
    # 3) two-kernel fallback path (large-batch regime), multiple tiles, f32
    out_two_pass = jax.block_until_ready(
        fwd(x, gamma, beta, w1, b1, w2, b2, tile_b=128, use_bf16=False,
            force_two_pass=True))
    # 4) fused path with a ragged batch (exercises zero-padding + variance correction)
    Br = 200
    xr = x[:Br]
    ref_r = reference_forward(xr, gamma, beta, w1, b1, w2, b2)
    out_ragged = jax.block_until_ready(
        fwd(xr, gamma, beta, w1, b1, w2, b2, use_bf16=False))

    assert out_fused_f32.shape == (B, 1)
    assert out_fused_bf16.shape == (B, 1)
    assert out_two_pass.shape == (B, 1)
    assert out_ragged.shape == (Br, 1)

    assert jnp.allclose(out_fused_f32, ref, atol=2e-4, rtol=2e-4), \
        float(jnp.max(jnp.abs(out_fused_f32 - ref)))
    assert jnp.allclose(out_two_pass, ref, atol=2e-4, rtol=2e-4), \
        float(jnp.max(jnp.abs(out_two_pass - ref)))
    assert jnp.allclose(out_ragged, ref_r, atol=2e-4, rtol=2e-4), \
        float(jnp.max(jnp.abs(out_ragged - ref_r)))
    assert jnp.allclose(out_fused_bf16, ref, atol=5e-2, rtol=5e-2), \
        float(jnp.max(jnp.abs(out_fused_bf16 - ref)))

    print("KERNEL_OK")
</pallas_src>

<mosaic_0001>
module attributes {stable_mosaic.version = 11 : i64} {
  func.func @fused_kernel(%arg0: i32, %arg1: memref<256x16xf32, #tpu.memory_space<vmem>>, %arg2: memref<1x16xf32, #tpu.memory_space<vmem>>, %arg3: memref<1x16xf32, #tpu.memory_space<vmem>>, %arg4: memref<16x50xf32, #tpu.memory_space<vmem>>, %arg5: memref<1x50xf32, #tpu.memory_space<vmem>>, %arg6: memref<1x50xf32, #tpu.memory_space<vmem>>, %arg7: memref<1x1xf32, #tpu.memory_space<smem>>, %arg8: memref<1x256xf32, #tpu.memory_space<vmem>>, %arg9: memref<1x16xf32, #tpu.memory_space<vmem>>, %arg10: memref<1x16xf32, #tpu.memory_space<vmem>>) attributes {dimension_semantics = [#tpu.dimension_semantics<arbitrary>], iteration_bounds = array<i64: 1>, scalar_prefetch = 0 : i64, scratch_operands = 2 : i64, tpu.core_type = #tpu.core_type<tc>, window_params = [{pipeline_mode = #tpu.pipeline_mode<synchronous>, transform_indices = @transform_0, window_bounds = array<i64: 256, 16>}, {pipeline_mode = #tpu.pipeline_mode<synchronous>, transform_indices = @transform_1, window_bounds = array<i64: 1, 16>}, {pipeline_mode = #tpu.pipeline_mode<synchronous>, transform_indices = @transform_2, window_bounds = array<i64: 1, 16>}, {pipeline_mode = #tpu.pipeline_mode<synchronous>, transform_indices = @transform_3, window_bounds = array<i64: 16, 50>}, {pipeline_mode = #tpu.pipeline_mode<synchronous>, transform_indices = @transform_4, window_bounds = array<i64: 1, 50>}, {pipeline_mode = #tpu.pipeline_mode<synchronous>, transform_indices = @transform_5, window_bounds = array<i64: 1, 50>}, {transform_indices = @transform_6, window_bounds = array<i64: 1, 1>}, {transform_indices = @transform_7, window_bounds = array<i64: 1, 256>}]} {
    %c0_i32 = arith.constant 0 : i32
    %0 = arith.cmpi eq, %arg0, %c0_i32 : i32
    %1 = arith.extui %0 : i1 to i32
    %c0_i32_0 = arith.constant 0 : i32
    %2 = arith.cmpi ne, %1, %c0_i32_0 : i32
    scf.if %2 {
      %cst_17 = arith.constant 0.000000e+00 : f32
      %27 = vector.broadcast %cst_17 : f32 to vector<1x16xf32>
      %c0_i32_18 = arith.constant 0 : i32
      %c256_i32_19 = arith.constant 256 : i32
      %28 = arith.muli %c0_i32_18, %c256_i32_19 : i32
      %29 = tpu.assume_multiple %28, 256 : i32
      %30 = arith.index_cast %29 : i32 to index
      %c0_20 = arith.constant 0 : index
      %31 = vector.load %arg1[%30, %c0_20] : memref<256x16xf32, #tpu.memory_space<vmem>>, vector<256x16xf32>
      %cst_21 = arith.constant dense<0.000000e+00> : vector<16xf32>
      %32 = vector.multi_reduction <add>, %31, %cst_21 [0] : vector<256x16xf32> to vector<16xf32>
      %33 = vector.shape_cast %32 : vector<16xf32> to vector<1x16xf32>
      %34 = arith.addf %27, %33 : vector<1x16xf32>
      %c1_i32 = arith.constant 1 : i32
      %cst_22 = arith.constant 3.906250e-03 : f32
      %35 = vector.broadcast %cst_22 : f32 to vector<1x16xf32>
      %36 = arith.mulf %34, %35 : vector<1x16xf32>
      %c0_i32_23 = arith.constant 0 : i32
      %c256_i32_24 = arith.constant 256 : i32
      %37 = arith.muli %c0_i32_23, %c256_i32_24 : i32
      %38 = tpu.assume_multiple %37, 256 : i32
      %39 = arith.index_cast %38 : i32 to index
      %c0_25 = arith.constant 0 : index
      %40 = vector.load %arg1[%39, %c0_25] : memref<256x16xf32, #tpu.memory_space<vmem>>, vector<256x16xf32>
      %41 = vector.broadcast %36 : vector<1x16xf32> to vector<256x16xf32>
      %42 = arith.subf %40, %41 : vector<256x16xf32>
      %43 = arith.mulf %42, %42 : vector<256x16xf32>
      %cst_26 = arith.constant dense<0.000000e+00> : vector<16xf32>
      %44 = vector.multi_reduction <add>, %43, %cst_26 [0] : vector<256x16xf32> to vector<16xf32>
      %45 = vector.shape_cast %44 : vector<16xf32> to vector<1x16xf32>
      %46 = arith.addf %27, %45 : vector<1x16xf32>
      %c1_i32_27 = arith.constant 1 : i32
      %cst_28 = arith.constant 3.906250e-03 : f32
      %47 = vector.broadcast %cst_28 : f32 to vector<1x16xf32>
      %48 = arith.mulf %46, %47 : vector<1x16xf32>
      %cst_29 = arith.constant 0.000000e+00 : f32
      %49 = vector.broadcast %cst_29 : f32 to vector<1x16xf32>
      %50 = arith.maximumf %48, %49 : vector<1x16xf32>
      %c0_30 = arith.constant 0 : index
      %c0_31 = arith.constant 0 : index
      %51 = vector.load %arg2[%c0_30, %c0_31] : memref<1x16xf32, #tpu.memory_space<vmem>>, vector<1x16xf32>
      %cst_32 = arith.constant 9.99999974E-6 : f32
      %52 = vector.broadcast %cst_32 : f32 to vector<1x16xf32>
      %53 = arith.addf %50, %52 : vector<1x16xf32>
      %54 = math.rsqrt %53 : vector<1x16xf32>
      %55 = arith.mulf %51, %54 : vector<1x16xf32>
      %c0_33 = arith.constant 0 : index
      %c0_34 = arith.constant 0 : index
      %56 = vector.load %arg9[%c0_33, %c0_34] : memref<1x16xf32, #tpu.memory_space<vmem>>, vector<1x16xf32>
      tpu.vector_store %arg9[%c0_33, %c0_34], %55 {strides = array<i32>} : memref<1x16xf32, #tpu.memory_space<vmem>>, vector<1x16xf32>,
      %c0_35 = arith.constant 0 : index
      %c0_36 = arith.constant 0 : index
      %57 = vector.load %arg3[%c0_35, %c0_36] : memref<1x16xf32, #tpu.memory_space<vmem>>, vector<1x16xf32>
      %58 = arith.mulf %36, %55 : vector<1x16xf32>
      %59 = arith.subf %57, %58 : vector<1x16xf32>
      %c0_37 = arith.constant 0 : index
      %c0_38 = arith.constant 0 : index
      %60 = vector.load %arg10[%c0_37, %c0_38] : memref<1x16xf32, #tpu.memory_space<vmem>>, vector<1x16xf32>
      tpu.vector_store %arg10[%c0_37, %c0_38], %59 {strides = array<i32>} : memref<1x16xf32, #tpu.memory_space<vmem>>, vector<1x16xf32>,
    } else {
    }
    %c256_i32 = arith.constant 256 : i32
    %3 = arith.muli %arg0, %c256_i32 : i32
    %4 = tpu.assume_multiple %3, 256 : i32
    %5 = arith.index_cast %4 : i32 to index
    %c0 = arith.constant 0 : index
    %6 = vector.load %arg1[%5, %c0] : memref<256x16xf32, #tpu.memory_space<vmem>>, vector<256x16xf32>
    %c0_1 = arith.constant 0 : index
    %c0_2 = arith.constant 0 : index
    %7 = vector.load %arg9[%c0_1, %c0_2] : memref<1x16xf32, #tpu.memory_space<vmem>>, vector<1x16xf32>
    %8 = vector.broadcast %7 : vector<1x16xf32> to vector<256x16xf32>
    %9 = arith.mulf %6, %8 : vector<256x16xf32>
    %c0_3 = arith.constant 0 : index
    %c0_4 = arith.constant 0 : index
    %10 = vector.load %arg10[%c0_3, %c0_4] : memref<1x16xf32, #tpu.memory_space<vmem>>, vector<1x16xf32>
    %11 = vector.broadcast %10 : vector<1x16xf32> to vector<256x16xf32>
    %12 = arith.addf %9, %11 : vector<256x16xf32>
    %c0_5 = arith.constant 0 : index
    %c0_6 = arith.constant 0 : index
    %13 = vector.load %arg4[%c0_5, %c0_6] : memref<16x50xf32, #tpu.memory_space<vmem>>, vector<16x50xf32>
    %cst = arith.constant dense<0.000000e+00> : vector<256x50xf32>
    %14 = tpu.matmul %12, %13, %cst {dimension_numbers = #tpu.dot_dimension_numbers<[1], [0], [0], [1], [0, 0, 1, 1], [], []>} : vector<256x16xf32>, vector<16x50xf32>, vector<256x50xf32> -> vector<256x50xf32>
    %c0_7 = arith.constant 0 : index
    %c0_8 = arith.constant 0 : index
    %15 = vector.load %arg5[%c0_7, %c0_8] : memref<1x50xf32, #tpu.memory_space<vmem>>, vector<1x50xf32>
    %16 = vector.broadcast %15 : vector<1x50xf32> to vector<256x50xf32>
    %17 = arith.addf %14, %16 : vector<256x50xf32>
    %cst_9 = arith.constant 0.000000e+00 : f32
    %18 = vector.broadcast %cst_9 : f32 to vector<256x50xf32>
    %19 = arith.maximumf %17, %18 : vector<256x50xf32>
    %c0_10 = arith.constant 0 : index
    %c0_11 = arith.constant 0 : index
    %20 = vector.load %arg6[%c0_10, %c0_11] : memref<1x50xf32, #tpu.memory_space<vmem>>, vector<1x50xf32>
    %c0_12 = arith.constant 0 : index
    %c0_13 = arith.constant 0 : index
    %21 = memref.load %arg7[%c0_12, %c0_13] : memref<1x1xf32, #tpu.memory_space<smem>>
    %22 = tpu.transpose %19, [1, 0] : vector<256x50xf32> -> vector<50x256xf32>
    %cst_14 = arith.constant dense<0.000000e+00> : vector<1x256xf32>
    %23 = tpu.matmul %20, %22, %cst_14 {dimension_numbers = #tpu.dot_dimension_numbers<[1], [0], [0], [1], [0, 0, 1, 1], [], []>} : vector<1x50xf32>, vector<50x256xf32>, vector<1x256xf32> -> vector<1x256xf32>
    %24 = vector.broadcast %21 : f32 to vector<1x256xf32>
    %25 = arith.addf %23, %24 : vector<1x256xf32>
    %c0_15 = arith.constant 0 : index
    %c0_16 = arith.constant 0 : index
    %26 = vector.load %arg8[%c0_15, %c0_16] : memref<1x256xf32, #tpu.memory_space<vmem>>, vector<1x256xf32>
    tpu.vector_store %arg8[%c0_15, %c0_16], %25 {strides = array<i32>} : memref<1x256xf32, #tpu.memory_space<vmem>>, vector<1x256xf32>,
    return
  }
  func.func @transform_0(%arg0: i32) -> (i32, i32) {
    %c0_i32 = arith.constant 0 : i32
    %c0_i32_0 = arith.constant 0 : i32
    %c0_i32_1 = arith.constant 0 : i32
    return %c0_i32, %c0_i32_0 : i32, i32
  }
  func.func @transform_1(%arg0: i32) -> (i32, i32) {
    %c0_i32 = arith.constant 0 : i32
    %c0_i32_0 = arith.constant 0 : i32
    %c0_i32_1 = arith.constant 0 : i32
    return %c0_i32, %c0_i32_0 : i32, i32
  }
  func.func @transform_2(%arg0: i32) -> (i32, i32) {
    %c0_i32 = arith.constant 0 : i32
    %c0_i32_0 = arith.constant 0 : i32
    %c0_i32_1 = arith.constant 0 : i32
    return %c0_i32, %c0_i32_0 : i32, i32
  }
  func.func @transform_3(%arg0: i32) -> (i32, i32) {
    %c0_i32 = arith.constant 0 : i32
    %c0_i32_0 = arith.constant 0 : i32
    %c0_i32_1 = arith.constant 0 : i32
    return %c0_i32, %c0_i32_0 : i32, i32
  }
  func.func @transform_4(%arg0: i32) -> (i32, i32) {
    %c0_i32 = arith.constant 0 : i32
    %c0_i32_0 = arith.constant 0 : i32
    %c0_i32_1 = arith.constant 0 : i32
    return %c0_i32, %c0_i32_0 : i32, i32
  }
  func.func @transform_5(%arg0: i32) -> (i32, i32) {
    %c0_i32 = arith.constant 0 : i32
    %c0_i32_0 = arith.constant 0 : i32
    %c0_i32_1 = arith.constant 0 : i32
    return %c0_i32, %c0_i32_0 : i32, i32
  }
  func.func @transform_6(%arg0: i32) -> (i32, i32) {
    %c0_i32 = arith.constant 0 : i32
    %c0_i32_0 = arith.constant 0 : i32
    %c0_i32_1 = arith.constant 0 : i32
    return %c0_i32, %c0_i32_0 : i32, i32
  }
  func.func @transform_7(%arg0: i32) -> (i32, i32) {
    %c0_i32 = arith.constant 0 : i32
    %c0_i32_0 = arith.constant 0 : i32
    return %arg0, %c0_i32 : i32, i32
  }
}

</mosaic_0001>

<bundles_post_ra>
// kernel: nn_baseline_forward.1
= control target key start
LH: loop header
LB: loop body
LE: loop exit
PB: predicated region body
PF: predicated region fallthrough
CT: control target
= control target key end

     0   :  { %vm64_vm0 = vcmask 130048   ;;  %s1541_s0 = inlined_call_operand.vmem [shape: f32[256,16], index: 0, kind: input, shape index: {}]   ;;  %s1542_s1 = inlined_call_operand.vmem [shape: f32[1,16], index: 1, kind: input, shape index: {}]   ;;  %s1543_s2 = inlined_call_operand.vmem [shape: f32[1,16], index: 2, kind: input, shape index: {}]   ;;  %s1544_s3 = inlined_call_operand.vmem [shape: f32[16,50], index: 3, kind: input, shape index: {}]   ;;  %s1545_s4 = inlined_call_operand.vmem [shape: f32[1,50], index: 4, kind: input, shape index: {}]   ;;  %s1546_s5 = inlined_call_operand.vmem [shape: f32[1,50], index: 5, kind: input, shape index: {}]   ;;  %s1547_s6 = inlined_call_operand.<no memory space> [shape: f32[1,1], index: 6, kind: input, shape index: {}]   ;;  %s1548_s7 = inlined_call_operand.hbm [shape: f32[1,256], index: 7, kind: output, shape index: {}]  }
   0x1   :  { %v398_v0 = vld [vmem:[%s1544_s3 + $0x8] sm:$0xff]  ;;  %v397_v1 = vld [vmem:[%s1544_s3] sm:$0xff]  ;;  %v977_v4 = vld [vmem:[%s1541_s0 + $0x10] sm:$0xff] }
   0x2   :  { %v967_v2 = vld [vmem:[%s1541_s0] sm:$0xff]  ;;  %514 = vmatpush.msra.mxu0 %v398_v0  ;;  %882 = vmatpush.msra.mxu3 %v398_v0  ;;  %v972_v3 = vld [vmem:[%s1541_s0 + $0x8] sm:$0xff]  ;;  %v982_v5 = vld [vmem:[%s1541_s0 + $0x18] sm:$0xff]  ;;  %v68_v8 = vsel %vm64_vm0, %v977_v4, 0.0 }
   0x3   :  { %v65_v6 = vsel %vm64_vm0, %v967_v2, 0.0  ;;  %v66_v7 = vsel %vm64_vm0, %v972_v3, 0.0  ;;  %881 = vmatpush.msra.mxu1 %v398_v0  ;;  %v993_v9 = vld [vmem:[%s1541_s0 + $0x20] sm:$0xff]  ;;  %v70_v11 = vsel %vm64_vm0, %v982_v5, 0.0  ;;  %v1000_v12 = vld [vmem:[%s1541_s0 + $0x28] sm:$0xff]  ;;  %v1007_v15 = vld [vmem:[%s1541_s0 + $0x30] sm:$0xff] }
   0x4   :  { %515 = vmatpush.msra.mxu0 %v397_v1  ;;  %884 = vmatpush.msra.mxu3 %v397_v1  ;;  %v67_v10 = vadd.f32 %v66_v7, %v65_v6  ;;  %v72_v14 = vsel %vm64_vm0, %v993_v9, 0.0  ;;  %v74_v17 = vsel %vm64_vm0, %v1000_v12, 0.0  ;;  %v1014_v18 = vld [vmem:[%s1541_s0 + $0x38] sm:$0xff]  ;;  %v76_v20 = vsel %vm64_vm0, %v1007_v15, 0.0  ;;  %v1021_v21 = vld [vmem:[%s1541_s0 + $0x40] sm:$0xff] }
   0x5   :  { %883 = vmatpush.msra.mxu1 %v397_v1 }
   0x6   :  { %v69_v13 = vadd.f32 %v68_v8, %v67_v10 }
   0x8   :  { %v71_v16 = vadd.f32 %v70_v11, %v69_v13 }
   0xa   :  { %v73_v19 = vadd.f32 %v72_v14, %v71_v16 }
   0xc   :  { %v75_v22 = vadd.f32 %v74_v17, %v73_v19 }
   0xd   :  { %13 = vsyncpa [#allocation6], 0  ;;  %v78_v23 = vsel %vm64_vm0, %v1014_v18, 0.0  ;;  %v1028_v24 = vld [vmem:[%s1541_s0 + $0x48] sm:$0xff]  ;;  %v80_v26 = vsel %vm64_vm0, %v1021_v21, 0.0  ;;  %v1035_v27 = vld [vmem:[%s1541_s0 + $0x50] sm:$0xff] }
   0xe   :  { %v77_v25 = vadd.f32 %v76_v20, %v75_v22  ;;  %v82_v29 = vsel %vm64_vm0, %v1028_v24, 0.0  ;;  %v1042_v30 = vld [vmem:[%s1541_s0 + $0x58] sm:$0xff]  ;;  %v84_v32 = vsel %vm64_vm0, %v1035_v27, 0.0  ;;  %v1049_v33 = vld [vmem:[%s1541_s0 + $0x60] sm:$0xff]  ;;  %v1056_v36 = vld [vmem:[%s1541_s0 + $0x68] sm:$0xff]  ;;  %vm285_vm4 = vcmask 122880  }
   0xf   :  { %v86_v35 = vsel %vm64_vm0, %v1042_v30, 0.0  ;;  %v88_v38 = vsel %vm64_vm0, %v1049_v33, 0.0  ;;  %v1063_v39 = vld [vmem:[%s1541_s0 + $0x70] sm:$0xff]  ;;  %v90_v41 = vsel %vm64_vm0, %v1056_v36, 0.0  ;;  %v1070_v42 = vld [vmem:[%s1541_s0 + $0x78] sm:$0xff]  ;;  %v1077_v45 = vld [vmem:[%s1541_s0 + $0x80] sm:$0xff] }
  0x10   :  { %v79_v28 = vadd.f32 %v78_v23, %v77_v25  ;;  %v92_v44 = vsel %vm64_vm0, %v1063_v39, 0.0  ;;  %v94_v47 = vsel %vm64_vm0, %v1070_v42, 0.0  ;;  %v1084_v48 = vld [vmem:[%s1541_s0 + $0x88] sm:$0xff]  ;;  %v96_v50 = vsel %vm64_vm0, %v1077_v45, 0.0  ;;  %v1091_v51 = vld [vmem:[%s1541_s0 + $0x90] sm:$0xff]  ;;  %v1098_v54 = vld [vmem:[%s1541_s0 + $0x98] sm:$0xff] }
  0x11   :  { %v98_v53 = vsel %vm64_vm0, %v1084_v48, 0.0  ;;  %v100_v56 = vsel %vm64_vm0, %v1091_v51, 0.0  ;;  %v1105_v57 = vld [vmem:[%s1541_s0 + $0xa0] sm:$0xff]  ;;  %v102_v59 = vsel %vm64_vm0, %v1098_v54, 0.0  ;;  %v1112_v60 = vld [vmem:[%s1541_s0 + $0xa8] sm:$0xff]  ;;  %v1119_v63 = vld [vmem:[%s1541_s0 + $0xb0] sm:$0xff] }
  0x12   :  { %v81_v31 = vadd.f32 %v80_v26, %v79_v28  ;;  %v104_v62 = vsel %vm64_vm0, %v1105_v57, 0.0  ;;  %v106_v1 = vsel %vm64_vm0, %v1112_v60, 0.0  ;;  %v1126_v6 = vld [vmem:[%s1541_s0 + $0xb8] sm:$0xff]  ;;  %v108_v8 = vsel %vm64_vm0, %v1119_v63, 0.0  ;;  %v1133_v10 = vld [vmem:[%s1541_s0 + $0xc0] sm:$0xff]  ;;  %v1140_v14 = vld [vmem:[%s1541_s0 + $0xc8] sm:$0xff] }
  0x13   :  { %v110_v13 = vsel %vm64_vm0, %v1126_v6, 0.0  ;;  %v112_v17 = vsel %vm64_vm0, %v1133_v10, 0.0  ;;  %v1147_v19 = vld [vmem:[%s1541_s0 + $0xd0] sm:$0xff]  ;;  %v114_v22 = vsel %vm64_vm0, %v1140_v14, 0.0  ;;  %v1154_v23 = vld [vmem:[%s1541_s0 + $0xd8] sm:$0xff]  ;;  %v1161_v28 = vld [vmem:[%s1541_s0 + $0xe0] sm:$0xff] }
  0x14   :  { %v83_v34 = vadd.f32 %v82_v29, %v81_v31  ;;  %v116_v26 = vsel %vm64_vm0, %v1147_v19, 0.0  ;;  %v118_v31 = vsel %vm64_vm0, %v1154_v23, 0.0  ;;  %vm648_vm5 = vcmask 408576   ;;  %s917_s26 = smov [#allocation5]   ;;  %s806_s30 = sshll.u32 %s1548_s7, 4  ;;  %s807_s30 = int_to_ptr.hbm [resolvable:$true] %s806_s30 }
  0x15   :  { %s804_s27 = sshll.u32 %s917_s26, 4  ;;  %vm791_vm6 = vcmask 1040384   ;;  %s805_s27 = int_to_ptr.vmem [resolvable:$true] %s804_s27 }
  0x16   :  { %v85_v37 = vadd.f32 %v84_v32, %v83_v34  ;;  %v1168_v32 = vld [vmem:[%s1541_s0 + $0xe8] sm:$0xff] }
  0x18   :  { %v87_v40 = vadd.f32 %v86_v35, %v85_v37  ;;  %v120_v35 = vsel %vm64_vm0, %v1161_v28, 0.0  ;;  %v1175_v37 = vld [vmem:[%s1541_s0 + $0xf0] sm:$0xff] }
  0x1a   :  { %v89_v43 = vadd.f32 %v88_v38, %v87_v40  ;;  %v122_v40 = vsel %vm64_vm0, %v1168_v32, 0.0 }
  0x1c   :  { %v91_v46 = vadd.f32 %v90_v41, %v89_v43  ;;  %v1182_v41 = vld [vmem:[%s1541_s0 + $0xf8] sm:$0xff] }
  0x1e   :  { %v93_v49 = vadd.f32 %v92_v44, %v91_v46  ;;  %v124_v44 = vsel %vm64_vm0, %v1175_v37, 0.0 }
  0x20   :  { %v95_v52 = vadd.f32 %v94_v47, %v93_v49  ;;  %v126_v47 = vsel %vm64_vm0, %v1182_v41, 0.0 }
  0x22   :  { %v97_v55 = vadd.f32 %v96_v50, %v95_v52 }
  0x24   :  { %v99_v58 = vadd.f32 %v98_v53, %v97_v55 }
  0x26   :  { %v101_v61 = vadd.f32 %v100_v56, %v99_v58 }
  0x28   :  { %v103_v0 = vadd.f32 %v102_v59, %v101_v61 }
  0x2a   :  { %v105_v7 = vadd.f32 %v104_v62, %v103_v0 }
  0x2c   :  { %v107_v11 = vadd.f32 %v106_v1, %v105_v7 }
  0x2e   :  { %v109_v16 = vadd.f32 %v108_v8, %v107_v11 }
  0x30   :  { %v111_v20 = vadd.f32 %v110_v13, %v109_v16 }
  0x32   :  { %v113_v25 = vadd.f32 %v112_v17, %v111_v20 }
  0x34   :  { %v115_v29 = vadd.f32 %v114_v22, %v113_v25 }
  0x36   :  { %v117_v34 = vadd.f32 %v116_v26, %v115_v29 }
  0x38   :  { %v119_v38 = vadd.f32 %v118_v31, %v117_v34 }
  0x3a   :  { %v121_v43 = vadd.f32 %v120_v35, %v119_v38 }
  0x3c   :  { %v123_v46 = vadd.f32 %v122_v40, %v121_v43 }
  0x3e   :  { %v125_v49 = vadd.f32 %v124_v44, %v123_v46 }
  0x40   :  { %v127_v50 = vadd.f32 %v126_v47, %v125_v49 }
  0x42   :  { %v128_v52 = vrot.slane %v127_v50, 4 }
  0x44   :  { %v129_v53 = vadd.f32 %v128_v52, %v127_v50 }
  0x46   :  { %v130_v55 = vrot.slane %v129_v53, 2 }
  0x48   :  { %v131_v56 = vadd.f32 %v130_v55, %v129_v53 }
  0x4a   :  { %v132_v58 = vrot.slane %v131_v56, 1 }
  0x4c   :  { %v133_v59 = vadd.f32 %v132_v58, %v131_v56 }
  0x4e   :  { %v1188_v61 = vmul.f32 0.00390625, %v133_v59 }
  0x50   :  { %v136_v62 = vsub.f32 %v967_v2, %v1188_v61  ;;  %v137_v0 = vsub.f32 %v972_v3, %v1188_v61  ;;  %v138_v1 = vsub.f32 %v977_v4, %v1188_v61  ;;  %v139_v7 = vsub.f32 %v982_v5, %v1188_v61 }
  0x51   :  { %v140_v8 = vsub.f32 %v993_v9, %v1188_v61  ;;  %v141_v17 = vsub.f32 %v1000_v12, %v1188_v61  ;;  %v142_v22 = vsub.f32 %v1007_v15, %v1188_v61  ;;  %v143_v35 = vsub.f32 %v1014_v18, %v1188_v61 }
  0x52   :  { %v168_v11 = vmul.f32 %v136_v62, %v136_v62  ;;  %v169_v13 = vmul.f32 %v137_v0, %v137_v0  ;;  %v170_v16 = vmul.f32 %v138_v1, %v138_v1  ;;  %v171_v20 = vmul.f32 %v139_v7, %v139_v7 }
  0x53   :  { %v172_v25 = vmul.f32 %v140_v8, %v140_v8  ;;  %v173_v38 = vmul.f32 %v141_v17, %v141_v17  ;;  %v144_v44 = vsub.f32 %v1021_v21, %v1188_v61  ;;  %v174_v46 = vmul.f32 %v142_v22, %v142_v22 }
  0x54   :  { %v200_v26 = vsel %vm64_vm0, %v168_v11, 0.0  ;;  %v201_v29 = vsel %vm64_vm0, %v169_v13, 0.0  ;;  %v203_v31 = vsel %vm64_vm0, %v170_v16, 0.0  ;;  %v205_v40 = vsel %vm64_vm0, %v171_v20, 0.0 }
  0x55   :  { %v202_v34 = vadd.f32 %v201_v29, %v200_v26  ;;  %v207_v47 = vsel %vm64_vm0, %v172_v25, 0.0  ;;  %v145_v50 = vsub.f32 %v1028_v24, %v1188_v61  ;;  %v175_v52 = vmul.f32 %v143_v35, %v143_v35 }
  0x56   :  { %v209_v53 = vsel %vm64_vm0, %v173_v38, 0.0  ;;  %v146_v56 = vsub.f32 %v1035_v27, %v1188_v61  ;;  %v176_v58 = vmul.f32 %v144_v44, %v144_v44  ;;  %v211_v59 = vsel %vm64_vm0, %v174_v46, 0.0 }
  0x57   :  { %v204_v43 = vadd.f32 %v203_v31, %v202_v34  ;;  %v147_v0 = vsub.f32 %v1042_v30, %v1188_v61  ;;  %v177_v1 = vmul.f32 %v145_v50, %v145_v50  ;;  %v213_v7 = vsel %vm64_vm0, %v175_v52, 0.0 }
  0x58   :  { %v148_v11 = vsub.f32 %v1049_v33, %v1188_v61  ;;  %v178_v13 = vmul.f32 %v146_v56, %v146_v56  ;;  %v215_v16 = vsel %vm64_vm0, %v176_v58, 0.0  ;;  %v149_v20 = vsub.f32 %v1056_v36, %v1188_v61 }
  0x59   :  { %v206_v49 = vadd.f32 %v205_v40, %v204_v43  ;;  %v179_v22 = vmul.f32 %v147_v0, %v147_v0  ;;  %v217_v25 = vsel %vm64_vm0, %v177_v1, 0.0  ;;  %v150_v29 = vsub.f32 %v1063_v39, %v1188_v61 }
  0x5a   :  { %v180_v31 = vmul.f32 %v148_v11, %v148_v11  ;;  %v219_v34 = vsel %vm64_vm0, %v178_v13, 0.0  ;;  %v151_v38 = vsub.f32 %v1070_v42, %v1188_v61  ;;  %v181_v40 = vmul.f32 %v149_v20, %v149_v20 }
  0x5b   :  { %v208_v55 = vadd.f32 %v207_v47, %v206_v49  ;;  %v221_v43 = vsel %vm64_vm0, %v179_v22, 0.0  ;;  %v152_v46 = vsub.f32 %v1077_v45, %v1188_v61  ;;  %v182_v47 = vmul.f32 %v150_v29, %v150_v29 }
  0x5c   :  { %v223_v49 = vsel %vm64_vm0, %v180_v31, 0.0  ;;  %v153_v52 = vsub.f32 %v1084_v48, %v1188_v61  ;;  %v154_v58 = vsub.f32 %v1091_v51, %v1188_v61  ;;  %v155_v1 = vsub.f32 %v1098_v54, %v1188_v61 }
  0x5d   :  { %v210_v62 = vadd.f32 %v209_v53, %v208_v55  ;;  %v183_v53 = vmul.f32 %v151_v38, %v151_v38  ;;  %v225_v55 = vsel %vm64_vm0, %v181_v40, 0.0  ;;  %v156_v13 = vsub.f32 %v1105_v57, %v1188_v61 }
  0x5e   :  { %v157_v22 = vsub.f32 %v1112_v60, %v1188_v61  ;;  %v158_v31 = vsub.f32 %v1119_v63, %v1188_v61  ;;  %v159_v40 = vsub.f32 %v1126_v6, %v1188_v61 }
  0x5f   :  { %v212_v8 = vadd.f32 %v211_v59, %v210_v62  ;;  %v184_v59 = vmul.f32 %v152_v46, %v152_v46  ;;  %v227_v62 = vsel %vm64_vm0, %v182_v47, 0.0  ;;  %v160_v47 = vsub.f32 %v1133_v10, %v1188_v61 }
  0x61   :  { %v214_v17 = vadd.f32 %v213_v7, %v212_v8  ;;  %v185_v7 = vmul.f32 %v153_v52, %v153_v52  ;;  %v229_v8 = vsel %vm64_vm0, %v183_v53, 0.0  ;;  %v161_v53 = vsub.f32 %v1140_v14, %v1188_v61 }
  0x63   :  { %v216_v26 = vadd.f32 %v215_v16, %v214_v17  ;;  %v186_v16 = vmul.f32 %v154_v58, %v154_v58  ;;  %v231_v17 = vsel %vm64_vm0, %v184_v59, 0.0  ;;  %v162_v59 = vsub.f32 %v1147_v19, %v1188_v61 }
  0x65   :  { %v218_v35 = vadd.f32 %v217_v25, %v216_v26  ;;  %v187_v25 = vmul.f32 %v155_v1, %v155_v1  ;;  %v233_v26 = vsel %vm64_vm0, %v185_v7, 0.0  ;;  %v163_v7 = vsub.f32 %v1154_v23, %v1188_v61 }
  0x67   :  { %v220_v44 = vadd.f32 %v219_v34, %v218_v35  ;;  %v188_v34 = vmul.f32 %v156_v13, %v156_v13  ;;  %v235_v35 = vsel %vm64_vm0, %v186_v16, 0.0  ;;  %v164_v16 = vsub.f32 %v1161_v28, %v1188_v61 }
  0x69   :  { %v222_v50 = vadd.f32 %v221_v43, %v220_v44  ;;  %v189_v43 = vmul.f32 %v157_v22, %v157_v22  ;;  %v237_v44 = vsel %vm64_vm0, %v187_v25, 0.0  ;;  %v165_v25 = vsub.f32 %v1168_v32, %v1188_v61 }
  0x6b   :  { %v224_v56 = vadd.f32 %v223_v49, %v222_v50  ;;  %v190_v49 = vmul.f32 %v158_v31, %v158_v31  ;;  %v239_v50 = vsel %vm64_vm0, %v188_v34, 0.0  ;;  %v166_v34 = vsub.f32 %v1175_v37, %v1188_v61 }
  0x6d   :  { %v226_v0 = vadd.f32 %v225_v55, %v224_v56  ;;  %v191_v55 = vmul.f32 %v159_v40, %v159_v40  ;;  %v241_v56 = vsel %vm64_vm0, %v189_v43, 0.0  ;;  %v167_v43 = vsub.f32 %v1182_v41, %v1188_v61 }
  0x6f   :  { %v228_v11 = vadd.f32 %v227_v62, %v226_v0  ;;  %v192_v62 = vmul.f32 %v160_v47, %v160_v47  ;;  %v243_v0 = vsel %vm64_vm0, %v190_v49, 0.0  ;;  %v198_v49 = vmul.f32 %v166_v34, %v166_v34 }
  0x71   :  { %v230_v20 = vadd.f32 %v229_v8, %v228_v11  ;;  %v193_v8 = vmul.f32 %v161_v53, %v161_v53  ;;  %v245_v11 = vsel %vm64_vm0, %v191_v55, 0.0  ;;  %v199_v53 = vmul.f32 %v167_v43, %v167_v43 }
  0x73   :  { %v232_v29 = vadd.f32 %v231_v17, %v230_v20  ;;  %v194_v17 = vmul.f32 %v162_v59, %v162_v59  ;;  %v247_v20 = vsel %vm64_vm0, %v192_v62, 0.0  ;;  %v261_v62 = vsel %vm64_vm0, %v199_v53, 0.0 }
  0x75   :  { %v234_v38 = vadd.f32 %v233_v26, %v232_v29  ;;  %v195_v26 = vmul.f32 %v163_v7, %v163_v7  ;;  %v249_v29 = vsel %vm64_vm0, %v193_v8, 0.0 }
  0x77   :  { %v236_v46 = vadd.f32 %v235_v35, %v234_v38  ;;  %v196_v35 = vmul.f32 %v164_v16, %v164_v16  ;;  %v251_v38 = vsel %vm64_vm0, %v194_v17, 0.0 }
  0x79   :  { %v238_v52 = vadd.f32 %v237_v44, %v236_v46  ;;  %v197_v44 = vmul.f32 %v165_v25, %v165_v25  ;;  %v253_v46 = vsel %vm64_vm0, %v195_v26, 0.0 }
  0x7b   :  { %v240_v58 = vadd.f32 %v239_v50, %v238_v52  ;;  %v255_v50 = vsel %vm64_vm0, %v196_v35, 0.0  ;;  %v257_v55 = vsel %vm64_vm0, %v197_v44, 0.0 }
  0x7d   :  { %v242_v1 = vadd.f32 %v241_v56, %v240_v58  ;;  %v259_v58 = vsel %vm64_vm0, %v198_v49, 0.0 }
  0x7f   :  { %v244_v13 = vadd.f32 %v243_v0, %v242_v1 }
  0x81   :  { %v246_v22 = vadd.f32 %v245_v11, %v244_v13 }
  0x83   :  { %v248_v31 = vadd.f32 %v247_v20, %v246_v22 }
  0x85   :  { %v250_v40 = vadd.f32 %v249_v29, %v248_v31 }
  0x87   :  { %v252_v47 = vadd.f32 %v251_v38, %v250_v40  ;;  %v272_v38 = vld [vmem:[%s1542_s1] sm:$0x1] }
  0x89   :  { %v254_v52 = vadd.f32 %v253_v46, %v252_v47  ;;  %v287_v46 = vld [vmem:[%s1543_s2] sm:$0x1] }
  0x8b   :  { %v256_v56 = vadd.f32 %v255_v50, %v254_v52 }
  0x8d   :  { %v258_v59 = vadd.f32 %v257_v55, %v256_v56 }
  0x8f   :  { %v260_v0 = vadd.f32 %v259_v58, %v258_v59 }
  0x91   :  { %v262_v1 = vadd.f32 %v261_v62, %v260_v0 }
  0x93   :  { %v263_v7 = vrot.slane %v262_v1, 4 }
  0x95   :  { %v264_v8 = vadd.f32 %v263_v7, %v262_v1 }
  0x97   :  { %v265_v11 = vrot.slane %v264_v8, 2 }
  0x99   :  { %v266_v13 = vadd.f32 %v265_v11, %v264_v8 }
  0x9b   :  { %v267_v16 = vrot.slane %v266_v13, 1 }
  0x9d   :  { %v268_v17 = vadd.f32 %v267_v16, %v266_v13 }
  0x9f   :  { %v270_v20 = vmul.f32 0.00390625, %v268_v17 }
  0xa1   :  { %v271_v22 = vmax.f32 %v270_v20, 0.0 }
  0xa3   :  { %v273_v25 = vadd.f32 1e-05, %v271_v22 }
  0xa5   :  { %889 = vrsqrt.f32 %v273_v25  ;;  %vm280_vm1 = vweird.f32 %v273_v25 }
  0xab   :  { %v890_v26 = vpop.eup %889 }
  0xac   :  { %v275_v29 = vmul.f32 %v890_v26, %v273_v25  ;;  %vm281_vm2 = vweird.f32 %v890_v26 }
  0xad   :  { %vm282_vm3 = vmor %vm280_vm1, %vm281_vm2 }
  0xae   :  { %v276_v31 = vmul.f32 %v890_v26, %v275_v29 }
  0xb0   :  { %v277_v34 = vmul.f32 0.5, %v276_v31 }
  0xb2   :  { %v278_v35 = vsub.f32 1.5, %v277_v34 }
  0xb4   :  { %v279_v40 = vmul.f32 %v890_v26, %v278_v35 }
  0xb6   :  { %v283_v43 = vsel %vm282_vm3, %v890_v26, %v279_v40 }
  0xb7   :  { %v284_v44 = vmul.f32 %v283_v43, %v272_v38 }
  0xb9   :  { %286 = vst.msk [vmem:[#allocation2] sm:$0x1] %vm285_vm4, %v284_v44  ;;  %v288_v47 = vmul.f32 %v284_v44, %v1188_v61 }
  0xbb   :  { %v289_v49 = vsub.f32 %v287_v46, %v288_v47 }
  0xbd   :  { %290 = vst.msk [vmem:[#allocation3] sm:$0x1] %vm285_vm4, %v289_v49 }
  0xc0   :  { %v1293_v50 = vld [vmem:[#allocation2] ss:$0 sm:$0xff] }
  0xc1   :  { %v329_v52 = vmul.f32 %v1293_v50, %v967_v2  ;;  %v350_v53 = vmul.f32 %v1293_v50, %v1112_v60  ;;  %v330_v61 = vmul.f32 %v1293_v50, %v972_v3  ;;  %v351_v59 = vmul.f32 %v1293_v50, %v1119_v63 }
  0xc2   :  { %v331_v62 = vmul.f32 %v1293_v50, %v977_v4  ;;  %v352_v0 = vmul.f32 %v1293_v50, %v1126_v6  ;;  %v342_v63 = vmul.f32 %v1293_v50, %v1056_v36  ;;  %v332_v7 = vmul.f32 %v1293_v50, %v982_v5 }
  0xc3   :  { %v353_v4 = vmul.f32 %v1293_v50, %v1133_v10  ;;  %v343_v36 = vmul.f32 %v1293_v50, %v1063_v39  ;;  %v333_v5 = vmul.f32 %v1293_v50, %v993_v9  ;;  %v354_v10 = vmul.f32 %v1293_v50, %v1140_v14 }
  0xc4   :  { %v1299_v55 = vld [vmem:[#allocation3] ss:$0 sm:$0xff]  ;;  %v344_v39 = vmul.f32 %v1293_v50, %v1070_v42  ;;  %v334_v9 = vmul.f32 %v1293_v50, %v1000_v12  ;;  %v355_v14 = vmul.f32 %v1293_v50, %v1147_v19  ;;  %v335_v42 = vmul.f32 %v1293_v50, %v1007_v15 }
  0xc5   :  { %v365_v56 = vadd.f32 %v1299_v55, %v329_v52  ;;  %v386_v58 = vadd.f32 %v1299_v55, %v350_v53  ;;  %v366_v2 = vadd.f32 %v1299_v55, %v330_v61  ;;  %v387_v60 = vadd.f32 %v1299_v55, %v351_v59 }
  0xc6   :  { %v367_v1 = vadd.f32 %v1299_v55, %v331_v62  ;;  %v388_v3 = vadd.f32 %v1299_v55, %v352_v0  ;;  %v378_v8 = vadd.f32 %v1299_v55, %v342_v63  ;;  %v368_v6 = vadd.f32 %v1299_v55, %v332_v7 }
  0xc7   :  { %815 = vmatmul.msk.f32.vlgmr.msra.gmra.mxu0 %vm64_vm0, %v365_v56  ;;  %836 = vmatmul.msk.f32.vlgmr.msra.gmra.mxu3 %vm64_vm0, %v386_v58  ;;  %v389_v11 = vadd.f32 %v1299_v55, %v353_v4  ;;  %v379_v13 = vadd.f32 %v1299_v55, %v343_v36  ;;  %v369_v16 = vadd.f32 %v1299_v55, %v333_v5 }
  0xc8   :  { %828 = vmatmul.msk.f32.vlgmr.msra.gmra.mxu1 %vm64_vm0, %v378_v8  ;;  %v390_v17 = vadd.f32 %v1299_v55, %v354_v10  ;;  %v380_v20 = vadd.f32 %v1299_v55, %v344_v39  ;;  %v370_v22 = vadd.f32 %v1299_v55, %v334_v9  ;;  %v391_v25 = vadd.f32 %v1299_v55, %v355_v14 }
  0xc9   :  { %v356_v12 = vmul.f32 %v1293_v50, %v1154_v23  ;;  %v371_v19 = vadd.f32 %v1299_v55, %v335_v42  ;;  %v336_v29 = vmul.f32 %v1293_v50, %v1014_v18  ;;  %v357_v31 = vmul.f32 %v1293_v50, %v1161_v28 }
  0xca   :  { %v337_v23 = vmul.f32 %v1293_v50, %v1021_v21  ;;  %v358_v35 = vmul.f32 %v1293_v50, %v1168_v32  ;;  %v345_v28 = vmul.f32 %v1293_v50, %v1077_v45  ;;  %v338_v40 = vmul.f32 %v1293_v50, %v1028_v24 }
  0xcb   :  { %v392_v26 = vadd.f32 %v1299_v55, %v356_v12  ;;  %v372_v34 = vadd.f32 %v1299_v55, %v336_v29  ;;  %v393_v15 = vadd.f32 %v1299_v55, %v357_v31  ;;  %v359_v21 = vmul.f32 %v1293_v50, %v1175_v37 }
  0xcc   :  { %v373_v38 = vadd.f32 %v1299_v55, %v337_v23  ;;  %v394_v18 = vadd.f32 %v1299_v55, %v358_v35  ;;  %v381_v43 = vadd.f32 %v1299_v55, %v345_v28  ;;  %v346_v32 = vmul.f32 %v1293_v50, %v1084_v48 }
  0xcd   :  { %v374_v44 = vadd.f32 %v1299_v55, %v338_v40  ;;  %v395_v45 = vadd.f32 %v1299_v55, %v359_v21  ;;  %v339_v24 = vmul.f32 %v1293_v50, %v1035_v27  ;;  %v360_v37 = vmul.f32 %v1293_v50, %v1182_v41 }
  0xce   :  { %v382_v46 = vadd.f32 %v1299_v55, %v346_v32  ;;  %v347_v48 = vmul.f32 %v1293_v50, %v1091_v51  ;;  %v340_v27 = vmul.f32 %v1293_v50, %v1042_v30  ;;  %v348_v41 = vmul.f32 %v1293_v50, %v1098_v54 }
  0xcf   :  { %816 = vmatmul.msk.f32.gmra.mxu0 %vm64_vm0, %v366_v2  ;;  %837 = vmatmul.msk.f32.gmra.mxu3 %vm64_vm0, %v387_v60  ;;  %v375_v47 = vadd.f32 %v1299_v55, %v339_v24  ;;  %v396_v49 = vadd.f32 %v1299_v55, %v360_v37  ;;  %v341_v56 = vmul.f32 %v1293_v50, %v1049_v33 }
  0xd0   :  { %829 = vmatmul.msk.f32.gmra.mxu1 %vm64_vm0, %v379_v13  ;;  %v383_v52 = vadd.f32 %v1299_v55, %v347_v48  ;;  %v376_v51 = vadd.f32 %v1299_v55, %v340_v27  ;;  %v384_v53 = vadd.f32 %v1299_v55, %v348_v41  ;;  %v349_v30 = vmul.f32 %v1293_v50, %v1105_v57 }
  0xd1   :  { %v377_v58 = vadd.f32 %v1299_v55, %v341_v56 }
  0xd2   :  { %v385_v54 = vadd.f32 %v1299_v55, %v349_v30 }
  0xd7   :  { %817 = vmatmul.msk.f32.gmra.mxu0 %vm64_vm0, %v367_v1  ;;  %838 = vmatmul.msk.f32.gmra.mxu3 %vm64_vm0, %v388_v3  ;;  %v1446_v3 = vld [vmem:[%s1545_s4] ss:$0 sm:$0xff] }
  0xd8   :  { %830 = vmatmul.msk.f32.gmra.mxu1 %vm64_vm0, %v380_v20 }
  0xdf   :  { %818 = vmatmul.msk.f32.gmra.mxu0 %vm64_vm0, %v368_v6  ;;  %839 = vmatmul.msk.f32.gmra.mxu3 %vm64_vm0, %v389_v11 }
  0xe0   :  { %831 = vmatmul.msk.f32.gmra.mxu1 %vm64_vm0, %v381_v43 }
  0xe7   :  { %819 = vmatmul.msk.f32.gmra.mxu0 %vm64_vm0, %v369_v16  ;;  %840 = vmatmul.msk.f32.gmra.mxu3 %vm64_vm0, %v390_v17 }
  0xe8   :  { %832 = vmatmul.msk.f32.gmra.mxu1 %vm64_vm0, %v382_v46 }
  0xef   :  { %820 = vmatmul.msk.f32.gmra.mxu0 %vm64_vm0, %v370_v22  ;;  %841 = vmatmul.msk.f32.gmra.mxu3 %vm64_vm0, %v391_v25 }
  0xf0   :  { %833 = vmatmul.msk.f32.gmra.mxu1 %vm64_vm0, %v383_v52 }
  0xf7   :  { %821 = vmatmul.msk.f32.gmra.mxu0 %vm64_vm0, %v371_v19  ;;  %842 = vmatmul.msk.f32.gmra.mxu3 %vm64_vm0, %v392_v26 }
  0xf8   :  { %834 = vmatmul.msk.f32.gmra.mxu1 %vm64_vm0, %v384_v53 }
  0xff   :  { %822 = vmatmul.msk.f32.gmra.mxu0 %vm64_vm0, %v372_v34  ;;  %843 = vmatmul.msk.f32.gmra.mxu3 %vm64_vm0, %v393_v15 }
 0x100   :  { %835 = vmatmul.msk.f32.gmra.mxu1 %vm64_vm0, %v385_v54 }
 0x107   :  { %823 = vmatmul.msk.f32.gmra.mxu0 %vm64_vm0, %v373_v38  ;;  %844 = vmatmul.msk.f32.gmra.mxu3 %vm64_vm0, %v394_v18 }
 0x10f   :  { %824 = vmatmul.msk.f32.gmra.mxu0 %vm64_vm0, %v374_v44  ;;  %845 = vmatmul.msk.f32.gmra.mxu3 %vm64_vm0, %v395_v45 }
 0x117   :  { %825 = vmatmul.msk.f32.gmra.mxu0 %vm64_vm0, %v375_v47  ;;  %846 = vmatmul.msk.f32.gmra.mxu3 %vm64_vm0, %v396_v49 }
 0x11f   :  { %826 = vmatmul.msk.f32.gmra.mxu0 %vm64_vm0, %v376_v51 }
 0x127   :  { %827 = vmatmul.msk.f32.gmra.mxu0 %vm64_vm0, %v377_v58 }
 0x144   :  { %v1425_v61 = vpop.f32.mrf.mxu0 }
 0x145   :  { %v556_v62 = vpop.f32.mrf.mxu1 }
 0x146   :  { %v557_v11 = vadd.f32 %v1446_v3, %v556_v62 }
 0x148   :  { %v626_v10 = vmax.f32 %v557_v11, 0.0 }
 0x14a   :  { %v1427_v59 = vpop.f32.mrf.mxu3 }
 0x14b   :  { %v581_v11 = vadd.f32 %v1446_v3, %v1427_v59 }
 0x14c   :  { %v1429_v2 = vpop.f32.mrf.mxu0 }
 0x14d   :  { %v559_v50 = vpop.f32.mrf.mxu1 }
 0x14e   :  { %v560_v7 = vadd.f32 %v1446_v3, %v559_v50 }
 0x150   :  { %v627_v36 = vmax.f32 %v560_v7, 0.0 }
 0x152   :  { %v1431_v33 = vpop.f32.mrf.mxu3 }
 0x154   :  { %v1433_v60 = vpop.f32.mrf.mxu0 }
 0x155   :  { %v562_v63 = vpop.f32.mrf.mxu1 }
 0x156   :  { %v563_v4 = vadd.f32 %v1446_v3, %v562_v63 }
 0x158   :  { %v628_v8 = vmax.f32 %v563_v4, 0.0 }
 0x15a   :  { %v1435_v0 = vpop.f32.mrf.mxu3  ;;  %847 = vmatpush.xpose.msk.msrb.mxu1 %vm648_vm5, %v628_v8 }
 0x15b   :  { %v587_v62 = vadd.f32 %v1446_v3, %v1435_v0 }
 0x15c   :  { %v1437_v57 = vpop.f32.mrf.mxu0 }
 0x15d   :  { %v1456_v12 = vpop.f32.mrf.mxu1  ;;  %v636_v4 = vmax.f32 %v587_v62, 0.0 }
 0x15e   :  { %848 = vmatpush.xpose.msk.msrb.mxu1 %vm648_vm5, %v627_v36 }
 0x162   :  { %v1439_v1 = vpop.f32.mrf.mxu3  ;;  %849 = vmatpush.xpose.msk.msrb.mxu1 %vm648_vm5, %v626_v10 }
 0x163   :  { %v590_v53 = vadd.f32 %v1446_v3, %v1439_v1  ;;  %v584_v1 = vadd.f32 %v1446_v3, %v1431_v33 }
 0x164   :  { %v1441_v55 = vpop.f32.mrf.mxu0 }
 0x165   :  { %v1462_v35 = vpop.f32.mrf.mxu1  ;;  %v637_v50 = vmax.f32 %v590_v53, 0.0  ;;  %v635_v36 = vmax.f32 %v584_v1, 0.0  ;;  %v530_v10 = vadd.f32 %v1446_v3, %v1441_v55  ;;  %v524_v55 = vadd.f32 %v1446_v3, %v1433_v60 }
 0x166   :  { %v518_v60 = vadd.f32 %v1446_v3, %v1425_v61  ;;  %v645_v61 = vld [vmem:[%s1546_s5] sm:$0x1] }
 0x16a   :  { %v592_v6 = vpop.f32.mrf.mxu3 }
 0x16b   :  { %v593_v52 = vadd.f32 %v1446_v3, %v592_v6 }
 0x16c   :  { %v1452_v5 = vpop.f32.mrf.mxu0 }
 0x16d   :  { %v571_v24 = vpop.f32.mrf.mxu1  ;;  %v638_v56 = vmax.f32 %v593_v52, 0.0  ;;  %v533_v8 = vadd.f32 %v1446_v3, %v1452_v5  ;;  %v527_v5 = vadd.f32 %v1446_v3, %v1437_v57  ;;  %v521_v57 = vadd.f32 %v1446_v3, %v1429_v2 }
 0x16e   :  { %v613_v2 = vmax.f32 %v518_v60, 0.0 }
 0x16f   :  { %v618_v33 = vmax.f32 %v533_v8, 0.0 }
 0x172   :  { %v595_v13 = vpop.f32.mrf.mxu3 }
 0x173   :  { %v596_v37 = vadd.f32 %v1446_v3, %v595_v13 }
 0x174   :  { %v535_v16 = vpop.f32.mrf.mxu0 }
 0x175   :  { %v639_v27 = vmax.f32 %v596_v37, 0.0  ;;  %v574_v58 = vpop.f32.mrf.mxu1  ;;  %v536_v63 = vadd.f32 %v1446_v3, %v535_v16  ;;  %v634_v16 = vmax.f32 %v581_v11, 0.0 }
 0x176   :  { %v575_v59 = vadd.f32 %v1446_v3, %v574_v58 }
 0x177   :  { %v619_v6 = vmax.f32 %v536_v63, 0.0 }
 0x17a   :  { %v598_v17 = vpop.f32.mrf.mxu3 }
 0x17b   :  { %v599_v32 = vadd.f32 %v1446_v3, %v598_v17  ;;  %v617_v17 = vmax.f32 %v530_v10, 0.0 }
 0x17c   :  { %v538_v39 = vpop.f32.mrf.mxu0 }
 0x17d   :  { %v640_v48 = vmax.f32 %v599_v32, 0.0  ;;  %v539_v30 = vadd.f32 %v1446_v3, %v538_v39  ;;  %v577_v0 = vpop.f32.mrf.mxu1 }
 0x17e   :  { %v578_v13 = vadd.f32 %v1446_v3, %v577_v0 }
 0x17f   :  { %v620_v7 = vmax.f32 %v539_v30, 0.0 }
 0x180   :  { %v633_v39 = vmax.f32 %v578_v13, 0.0 }
 0x182   :  { %v601_v9 = vpop.f32.mrf.mxu3 }
 0x183   :  { %v602_v18 = vadd.f32 %v1446_v3, %v601_v9  ;;  %v616_v9 = vmax.f32 %v527_v5, 0.0 }
 0x184   :  { %v541_v14 = vpop.f32.mrf.mxu0 }
 0x185   :  { %v641_v44 = vmax.f32 %v602_v18, 0.0  ;;  %v542_v41 = vadd.f32 %v1446_v3, %v541_v14  ;;  %v572_v14 = vadd.f32 %v1446_v3, %v571_v24 }
 0x187   :  { %v621_v54 = vmax.f32 %v542_v41, 0.0 }
 0x18a   :  { %v604_v20 = vpop.f32.mrf.mxu3 }
 0x18b   :  { %v605_v15 = vadd.f32 %v1446_v3, %v604_v20  ;;  %v632_v20 = vmax.f32 %v575_v59, 0.0 }
 0x18c   :  { %v544_v22 = vpop.f32.mrf.mxu0 }
 0x18d   :  { %v642_v28 = vmax.f32 %v605_v15, 0.0  ;;  %v545_v47 = vadd.f32 %v1446_v3, %v544_v22  ;;  %v615_v22 = vmax.f32 %v524_v55, 0.0 }
 0x18f   :  { %v622_v51 = vmax.f32 %v545_v47, 0.0 }
 0x192   :  { %v607_v25 = vpop.f32.mrf.mxu3 }
 0x193   :  { %v608_v31 = vadd.f32 %v1446_v3, %v607_v25  ;;  %v569_v25 = vadd.f32 %v1446_v3, %v1462_v35 }
 0x194   :  { %v547_v42 = vpop.f32.mrf.mxu0 }
 0x195   :  { %v643_v23 = vmax.f32 %v608_v31, 0.0  ;;  %v548_v45 = vadd.f32 %v1446_v3, %v547_v42  ;;  %v631_v42 = vmax.f32 %v572_v14, 0.0 }
 0x197   :  { %v623_v49 = vmax.f32 %v548_v45, 0.0 }
 0x19a   :  { %v610_v19 = vpop.f32.mrf.mxu3 }
 0x19b   :  { %v611_v26 = vadd.f32 %v1446_v3, %v610_v19  ;;  %v614_v19 = vmax.f32 %v521_v57, 0.0 }
 0x19c   :  { %v550_v29 = vpop.f32.mrf.mxu0 }
 0x19d   :  { %v644_v34 = vmax.f32 %v611_v26, 0.0  ;;  %v551_v21 = vadd.f32 %v1446_v3, %v550_v29  ;;  %v566_v26 = vadd.f32 %v1446_v3, %v1456_v12  ;;  %v630_v29 = vmax.f32 %v569_v25, 0.0 }
 0x19f   :  { %864 = vmatpush.xpose.msk.msra.mxu2 %vm648_vm5, %v644_v34  ;;  %v624_v46 = vmax.f32 %v551_v21, 0.0  ;;  %v629_v31 = vmax.f32 %v566_v26, 0.0  ;;  %v794_v34 = vlaneseq }
 0x1a1   :  { %vm796_vm7 = vcmp.lt.s32.totalorder %v794_v34, 256 }
 0x1a3   :  { %865 = vmatpush.xpose.msk.msra.mxu2 %vm648_vm5, %v643_v23 }
 0x1a4   :  { %v553_v38 = vpop.f32.mrf.mxu0 }
 0x1a5   :  { %v554_v40 = vadd.f32 %v1446_v3, %v553_v38  ;;  %v647_v3 = vstv %s1547_s6 }
 0x1a7   :  { %v625_v43 = vmax.f32 %v554_v40, 0.0  ;;  %866 = vmatpush.xpose.msk.msra.mxu2 %vm648_vm5, %v642_v28 }
 0x1a9   :  { %850 = vmatpush.xpose.msk.msrb.mxu1 %vm648_vm5, %v625_v43 }
 0x1ab   :  { %867 = vmatpush.xpose.msk.msra.mxu2 %vm648_vm5, %v641_v44 }
 0x1ad   :  { %851 = vmatpush.xpose.msk.msrb.mxu1 %vm648_vm5, %v624_v46 }
 0x1af   :  { %868 = vmatpush.xpose.msk.msra.mxu2 %vm648_vm5, %v640_v48 }
 0x1b1   :  { %852 = vmatpush.xpose.msk.msrb.mxu1 %vm648_vm5, %v623_v49 }
 0x1b3   :  { %869 = vmatpush.xpose.msk.msra.mxu2 %vm648_vm5, %v639_v27 }
 0x1b5   :  { %853 = vmatpush.xpose.msk.msrb.mxu1 %vm648_vm5, %v622_v51 }
 0x1b7   :  { %870 = vmatpush.xpose.msk.msra.mxu2 %vm648_vm5, %v638_v56 }
 0x1b9   :  { %854 = vmatpush.xpose.msk.msrb.mxu1 %vm648_vm5, %v621_v54 }
 0x1bb   :  { %871 = vmatpush.xpose.msk.msra.mxu2 %vm648_vm5, %v637_v50 }
 0x1bd   :  { %855 = vmatpush.xpose.msk.msrb.mxu1 %vm648_vm5, %v620_v7 }
 0x1bf   :  { %872 = vmatpush.xpose.msk.msra.mxu2 %vm648_vm5, %v636_v4 }
 0x1c1   :  { %856 = vmatpush.xpose.msk.msrb.mxu1 %vm648_vm5, %v619_v6 }
 0x1c3   :  { %873 = vmatpush.xpose.msk.msra.mxu2 %vm648_vm5, %v635_v36 }
 0x1c5   :  { %857 = vmatpush.xpose.msk.msrb.mxu1 %vm648_vm5, %v618_v33 }
 0x1c7   :  { %874 = vmatpush.xpose.msk.msra.mxu2 %vm648_vm5, %v634_v16 }
 0x1c9   :  { %858 = vmatpush.xpose.msk.msrb.mxu1 %vm648_vm5, %v617_v17 }
 0x1cb   :  { %875 = vmatpush.xpose.msk.msra.mxu2 %vm648_vm5, %v633_v39 }
 0x1cd   :  { %859 = vmatpush.xpose.msk.msrb.mxu1 %vm648_vm5, %v616_v9 }
 0x1cf   :  { %876 = vmatpush.xpose.msk.msra.mxu2 %vm648_vm5, %v632_v20 }
 0x1d1   :  { %860 = vmatpush.xpose.msk.msrb.mxu1 %vm648_vm5, %v615_v22 }
 0x1d3   :  { %877 = vmatpush.xpose.msk.msra.mxu2 %vm648_vm5, %v631_v42 }
 0x1d5   :  { %861 = vmatpush.xpose.msk.msrb.mxu1 %vm648_vm5, %v614_v19 }
 0x1d7   :  { %878 = vmatpush.xpose.msk.msra.mxu2 %vm648_vm5, %v630_v29 }
 0x1d9   :  { %862 = vmatpush.xpose.msk.msrb.mxu1 %vm648_vm5, %v613_v2 }
 0x1db   :  { %879 = vmatpush.xpose.msk.msra.mxu2 %vm648_vm5, %v629_v31 }
 0x1dc   :  { %863 = vmatmul.msk.f32.vlgmr.msrb.gmra.mxu1 %vm648_vm5, %v645_v61 }
 0x1de   :  { %880 = vmatmul.msk.f32.vlgmr.msra.gmra.mxu2 %vm648_vm5, %v645_v61 }
 0x259   :  { %v765_v12 = vpop.f32.mrf.mxu1 }
 0x25a   :  { %v766_v35 = vadd.f32 %v765_v12, %v647_v3 }
 0x261   :  { %v785_v15 = vpop.f32.mrf.mxu2 }
 0x262   :  { %v786_v23 = vadd.f32 %v785_v15, %v647_v3 }
 0x264   :  { %v790_v38 = vrot.slane %v786_v23, 7 }
 0x266   :  { %v792_v18 = vsel %vm791_vm6, %v766_v35, %v790_v38 }
 0x267   :  { %798 = vst.msk [vmem:[#allocation5] sm:$0x3] %vm796_vm7, %v792_v18 }
 0x268   :  { %809 = dma.vmem_to_hbm [thread:$0]  %s805_s27, 32, %s807_s30, [#allocation6]  }
 0x269   :  { %915 = dma.done.wait [#allocation6], 32  }
 0x26a   :  { %916 = vsyncadd [#allocation6], 4294967264 }
 0x26b   :  { %814 = vsyncpa [#allocation6], 1 }

</bundles_post_ra>
